<compile_context>
chip_gen: v7x
topology: tpu7x:2x2x1
jax: 0.10.0
libtpu: 0.0.40
codegen_flags: <defaults>
</compile_context>

<pallas_src>
import functools
import math

import jax
import jax.numpy as jnp
from jax import lax
from jax.experimental import pallas as pl
from jax.experimental.pallas import tpu as pltpu


def _tile(dim, target, align):
    """Largest multiple of `align` <= target that divides `dim`; else full dim.

    A block equal to the full array dim is always legal (the (8,128) rule's
    full-dim exception), so the fallback is safe.
    """
    if dim <= target:
        return dim
    t = (target // align) * align
    while t >= align:
        if dim % t == 0:
            return t
        t -= align
    return dim


# ---------------------------------------------------------------------------
# Kernel 1: fused QKV projection   y = x @ [Wq|Wk|Wv] + [bq|bk|bv]
# Tiled (M, N, K) matmul with f32 accumulator (worked tiled-matmul pattern).
# ---------------------------------------------------------------------------
def _qkv_proj_kernel(x_ref, w_ref, b_ref, o_ref, acc_ref):
    @pl.when(pl.program_id(2) == 0)
    def _():
        acc_ref[...] = jnp.zeros(acc_ref.shape, acc_ref.dtype)

    acc_ref[...] += jnp.dot(
        x_ref[...], w_ref[...], preferred_element_type=jnp.float32
    )

    @pl.when(pl.program_id(2) == pl.num_programs(2) - 1)
    def _():
        o_ref[...] = (acc_ref[...] + b_ref[...].astype(jnp.float32)).astype(o_ref.dtype)


def fused_qkv_projection(x2d, w_qkv, b_qkv, *, tm=256, tn=256, tk=512):
    """x2d: (M, C), w_qkv: (C, 3C), b_qkv: (1, 3C) -> (M, 3C)."""
    M, K = x2d.shape
    N = w_qkv.shape[1]
    tm = _tile(M, tm, 8)
    tn = _tile(N, tn, 128)
    tk = _tile(K, tk, 128)
    grid = (M // tm, N // tn, K // tk)
    # Per-step VMEM (f32): x tile + w tile + out tile + acc, double-buffered
    # inputs — well under the default scoped VMEM limit on v5e/v6e/v7x, so no
    # vmem_limit_bytes override is needed for these tile sizes.
    return pl.pallas_call(
        _qkv_proj_kernel,
        out_shape=jax.ShapeDtypeStruct((M, N), x2d.dtype),
        grid=grid,
        in_specs=[
            pl.BlockSpec((tm, tk), lambda i, j, k: (i, k)),
            pl.BlockSpec((tk, tn), lambda i, j, k: (k, j)),
            pl.BlockSpec((1, tn), lambda i, j, k: (0, j)),
        ],
        out_specs=pl.BlockSpec((tm, tn), lambda i, j, k: (i, j)),
        scratch_shapes=[pltpu.VMEM((tm, tn), jnp.float32)],
        compiler_params=pltpu.CompilerParams(
            dimension_semantics=("parallel", "parallel", "arbitrary")
        ),
    )(x2d, w_qkv, b_qkv)


# ---------------------------------------------------------------------------
# Kernel 2: flash-style multi-head self-attention (online softmax).
# One grid step = (batch b, q-tile qi, kv-tile ki); all heads handled inside.
# q/k/v refs are column blocks 0/1/2 of the fused (B, T, 3C) projection.
# Output written lane-dense as (1, tq, C) in (B, T, C) layout.
# ---------------------------------------------------------------------------
def _mha_flash_kernel(q_ref, k_ref, v_ref, o_ref, m_ref, l_ref, acc_ref,
                      *, n_head, hd, scale):
    ki = pl.program_id(2)

    @pl.when(ki == 0)
    def _():
        m_ref[...] = jnp.full(m_ref.shape, -jnp.inf, m_ref.dtype)
        l_ref[...] = jnp.zeros(l_ref.shape, l_ref.dtype)
        acc_ref[...] = jnp.zeros(acc_ref.shape, acc_ref.dtype)

    q = q_ref[0]  # (tq, C)
    k = k_ref[0]  # (tk, C)
    v = v_ref[0]  # (tk, C)

    # Static loop over heads (n_head is small); slices are static -> cheap views.
    for h in range(n_head):
        lo = h * hd
        qh = q[:, lo:lo + hd] * jnp.asarray(scale, q.dtype)   # scale folded into q
        kh = k[:, lo:lo + hd]
        vh = v[:, lo:lo + hd]
        # QK^T without materializing k.T: contract the hd axis directly.
        s = lax.dot_general(
            qh, kh, (((1,), (1,)), ((), ())),
            preferred_element_type=jnp.float32,
        )  # (tq, tk)
        m_prev = m_ref[h]                                      # (tq, 1)
        l_prev = l_ref[h]                                      # (tq, 1)
        m_new = jnp.maximum(m_prev, jnp.max(s, axis=-1, keepdims=True))
        alpha = jnp.exp(m_prev - m_new)
        p = jnp.exp(s - m_new)
        l_ref[h] = alpha * l_prev + jnp.sum(p, axis=-1, keepdims=True)
        acc_ref[:, lo:lo + hd] = alpha * acc_ref[:, lo:lo + hd] + jnp.dot(
            p.astype(vh.dtype), vh, preferred_element_type=jnp.float32
        )
        m_ref[h] = m_new

    @pl.when(ki == pl.num_programs(2) - 1)
    def _():
        # Normalize each head block and emit one lane-dense (tq, C) store.
        cols = []
        for h in range(n_head):
            lo = h * hd
            inv_l = pl.reciprocal(l_ref[h], approx=True)       # EUP slot
            cols.append(acc_ref[:, lo:lo + hd] * inv_l)
        o_ref[0] = jnp.concatenate(cols, axis=-1).astype(o_ref.dtype)


def flash_mha(qkv, n_head, *, tq=128, tk=128):
    """qkv: (B, T, 3C) fused projection (q | k | v) -> (B, T, C) attention out."""
    B, T, C3 = qkv.shape
    C = C3 // 3
    hd = C // n_head
    tq = _tile(T, tq, 8)
    tk = _tile(T, tk, 8)
    scale = 1.0 / math.sqrt(float(hd))
    kernel = functools.partial(_mha_flash_kernel, n_head=n_head, hd=hd, scale=scale)
    return pl.pallas_call(
        kernel,
        out_shape=jax.ShapeDtypeStruct((B, T, C), qkv.dtype),
        grid=(B, T // tq, T // tk),
        in_specs=[
            pl.BlockSpec((1, tq, C), lambda b, qi, ki: (b, qi, 0)),  # q columns
            pl.BlockSpec((1, tk, C), lambda b, qi, ki: (b, ki, 1)),  # k columns
            pl.BlockSpec((1, tk, C), lambda b, qi, ki: (b, ki, 2)),  # v columns
        ],
        out_specs=pl.BlockSpec((1, tq, C), lambda b, qi, ki: (b, qi, 0)),
        scratch_shapes=[
            pltpu.VMEM((n_head, tq, 1), jnp.float32),  # running max  m
            pltpu.VMEM((n_head, tq, 1), jnp.float32),  # running sum  l
            pltpu.VMEM((tq, C), jnp.float32),          # output accumulator
        ],
        compiler_params=pltpu.CompilerParams(
            dimension_semantics=("parallel", "parallel", "arbitrary")
        ),
    )(qkv, qkv, qkv)


# ---------------------------------------------------------------------------
# Module wrapper (self-attention path; mask=None, cross_attention=False)
# ---------------------------------------------------------------------------
def multi_headed_attention(x, params, n_head):
    B, T, C = x.shape
    assert C % n_head == 0
    x2d = x.reshape(B * T, C)
    # Fuse the three projections (q | k | v) along the output axis.
    w_qkv = jnp.concatenate([params["q_w"], params["k_w"], params["v_w"]], axis=1)
    b_qkv = jnp.concatenate([params["q_b"], params["k_b"], params["v_b"]], axis=1)
    qkv = fused_qkv_projection(x2d, w_qkv, b_qkv).reshape(B, T, 3 * C)
    # TODO(synk): mask != None (causal) branch and cross_attention=True branch
    # (decoder-provided K/V) are not implemented; module defaults are covered.
    return flash_mha(qkv, n_head)


# Pure-JAX reference for validation (mirrors the PyTorch forward exactly).
def reference(x, params, n_head):
    B, T, C = x.shape
    hd = C // n_head
    x2d = x.reshape(B * T, C)
    k = (x2d @ params["k_w"] + params["k_b"]).reshape(B, T, n_head, hd).transpose(0, 2, 1, 3)
    q = (x2d @ params["q_w"] + params["q_b"]).reshape(B, T, n_head, hd).transpose(0, 2, 1, 3)
    v = (x2d @ params["v_w"] + params["v_b"]).reshape(B, T, n_head, hd).transpose(0, 2, 1, 3)
    scores = jnp.einsum("bhqd,bhkd->bhqk", q, k) / jnp.sqrt(jnp.float32(hd))
    p = jax.nn.softmax(scores, axis=-1)
    out = jnp.einsum("bhqk,bhkd->bhqd", p, v)
    return out.transpose(0, 2, 1, 3).reshape(B, T, C)


if __name__ == "__main__":
    # Small config consistent with the module (n_head=6, embedd_dim % n_head == 0).
    B, T, C, n_head = 2, 512, 384, 6  # head dim = 64

    key = jax.random.PRNGKey(0)
    ks = jax.random.split(key, 7)
    x = jax.random.normal(ks[0], (B, T, C), dtype=jnp.float32)

    scale = 1.0 / math.sqrt(C)
    params = {
        "k_w": jax.random.uniform(ks[1], (C, C), jnp.float32, -scale, scale),
        "k_b": jax.random.uniform(ks[2], (1, C), jnp.float32, -scale, scale),
        "q_w": jax.random.uniform(ks[3], (C, C), jnp.float32, -scale, scale),
        "q_b": jax.random.uniform(ks[4], (1, C), jnp.float32, -scale, scale),
        "v_w": jax.random.uniform(ks[5], (C, C), jnp.float32, -scale, scale),
        "v_b": jax.random.uniform(ks[6], (1, C), jnp.float32, -scale, scale),
    }

    out = multi_headed_attention(x, params, n_head)
    out = jax.block_until_ready(out)

    ref = reference(x, params, n_head)
    assert out.shape == (B, T, C)
    max_err = float(jnp.max(jnp.abs(out - ref)))
    assert jnp.allclose(out, ref, atol=5e-3, rtol=5e-3), f"mismatch vs reference (max abs err {max_err})"

    print("KERNEL_OK")
</pallas_src>

<mosaic_0001>
module attributes {stable_mosaic.version = 11 : i64} {
  func.func @_qkv_proj_kernel(%arg0: i32, %arg1: i32, %arg2: i32, %arg3: memref<256x384xf32, #tpu.memory_space<vmem>>, %arg4: memref<384x128xf32, #tpu.memory_space<vmem>>, %arg5: memref<1x128xf32, #tpu.memory_space<vmem>>, %arg6: memref<256x128xf32, #tpu.memory_space<vmem>>, %arg7: memref<256x128xf32, #tpu.memory_space<vmem>>) attributes {dimension_semantics = [#tpu.dimension_semantics<parallel>, #tpu.dimension_semantics<parallel>, #tpu.dimension_semantics<arbitrary>], iteration_bounds = array<i64: 4, 9, 1>, scalar_prefetch = 0 : i64, scratch_operands = 1 : i64, tpu.core_type = #tpu.core_type<tc>, window_params = [{transform_indices = @transform_0, window_bounds = array<i64: 256, 384>}, {transform_indices = @transform_1, window_bounds = array<i64: 384, 128>}, {transform_indices = @transform_2, window_bounds = array<i64: 1, 128>}, {transform_indices = @transform_3, window_bounds = array<i64: 256, 128>}]} {
    %c0_i32 = arith.constant 0 : i32
    %0 = arith.cmpi eq, %arg2, %c0_i32 : i32
    %1 = arith.extui %0 : i1 to i32
    %c0_i32_0 = arith.constant 0 : i32
    %2 = arith.cmpi ne, %1, %c0_i32_0 : i32
    scf.if %2 {
      %cst_10 = arith.constant 0.000000e+00 : f32
      %12 = vector.broadcast %cst_10 : f32 to vector<256x128xf32>
      %c0_11 = arith.constant 0 : index
      %c0_12 = arith.constant 0 : index
      %13 = vector.load %arg7[%c0_11, %c0_12] : memref<256x128xf32, #tpu.memory_space<vmem>>, vector<256x128xf32>
      tpu.vector_store %arg7[%c0_11, %c0_12], %12 {strides = array<i32>} : memref<256x128xf32, #tpu.memory_space<vmem>>, vector<256x128xf32>,
    } else {
    }
    %c0 = arith.constant 0 : index
    %c0_1 = arith.constant 0 : index
    %3 = vector.load %arg7[%c0, %c0_1] : memref<256x128xf32, #tpu.memory_space<vmem>>, vector<256x128xf32>
    %c0_2 = arith.constant 0 : index
    %c0_3 = arith.constant 0 : index
    %4 = vector.load %arg3[%c0_2, %c0_3] : memref<256x384xf32, #tpu.memory_space<vmem>>, vector<256x384xf32>
    %c0_4 = arith.constant 0 : index
    %c0_5 = arith.constant 0 : index
    %5 = vector.load %arg4[%c0_4, %c0_5] : memref<384x128xf32, #tpu.memory_space<vmem>>, vector<384x128xf32>
    %cst = arith.constant dense<0.000000e+00> : vector<256x128xf32>
    %6 = tpu.matmul %4, %5, %cst {dimension_numbers = #tpu.dot_dimension_numbers<[1], [0], [0], [1], [0, 0, 1, 1], [], []>} : vector<256x384xf32>, vector<384x128xf32>, vector<256x128xf32> -> vector<256x128xf32>
    %7 = arith.addf %3, %6 : vector<256x128xf32>
    %c0_6 = arith.constant 0 : index
    %c0_7 = arith.constant 0 : index
    %8 = vector.load %arg7[%c0_6, %c0_7] : memref<256x128xf32, #tpu.memory_space<vmem>>, vector<256x128xf32>
    tpu.vector_store %arg7[%c0_6, %c0_7], %7 {strides = array<i32>} : memref<256x128xf32, #tpu.memory_space<vmem>>, vector<256x128xf32>,
    %c0_i32_8 = arith.constant 0 : i32
    %9 = arith.cmpi eq, %arg2, %c0_i32_8 : i32
    %10 = arith.extui %9 : i1 to i32
    %c0_i32_9 = arith.constant 0 : i32
    %11 = arith.cmpi ne, %10, %c0_i32_9 : i32
    scf.if %11 {
      %c0_10 = arith.constant 0 : index
      %c0_11 = arith.constant 0 : index
      %12 = vector.load %arg7[%c0_10, %c0_11] : memref<256x128xf32, #tpu.memory_space<vmem>>, vector<256x128xf32>
      %c0_12 = arith.constant 0 : index
      %c0_13 = arith.constant 0 : index
      %13 = vector.load %arg5[%c0_12, %c0_13] : memref<1x128xf32, #tpu.memory_space<vmem>>, vector<1x128xf32>
      %14 = vector.broadcast %13 : vector<1x128xf32> to vector<256x128xf32>
      %15 = arith.addf %12, %14 : vector<256x128xf32>
      %c0_14 = arith.constant 0 : index
      %c0_15 = arith.constant 0 : index
      %16 = vector.load %arg6[%c0_14, %c0_15] : memref<256x128xf32, #tpu.memory_space<vmem>>, vector<256x128xf32>
      tpu.vector_store %arg6[%c0_14, %c0_15], %15 {strides = array<i32>} : memref<256x128xf32, #tpu.memory_space<vmem>>, vector<256x128xf32>,
    } else {
    }
    return
  }
  func.func @transform_0(%arg0: i32, %arg1: i32, %arg2: i32) -> (i32, i32) {
    %c0_i32 = arith.constant 0 : i32
    return %arg0, %arg2 : i32, i32
  }
  func.func @transform_1(%arg0: i32, %arg1: i32, %arg2: i32) -> (i32, i32) {
    %c0_i32 = arith.constant 0 : i32
    return %arg2, %arg1 : i32, i32
  }
  func.func @transform_2(%arg0: i32, %arg1: i32, %arg2: i32) -> (i32, i32) {
    %c0_i32 = arith.constant 0 : i32
    %c0_i32_0 = arith.constant 0 : i32
    return %c0_i32, %arg1 : i32, i32
  }
  func.func @transform_3(%arg0: i32, %arg1: i32, %arg2: i32) -> (i32, i32) {
    %c0_i32 = arith.constant 0 : i32
    return %arg0, %arg1 : i32, i32
  }
}

</mosaic_0001>

<bundles_post_ra>
// kernel: tpu_custom_call.1
= control target key start
LH: loop header
LB: loop body
LE: loop exit
PB: predicated region body
PF: predicated region fallthrough
CT: control target
= control target key end

     0   :  { %s2621_s0 = inlined_call_operand.hbm [shape: f32[1024,384], index: 0, kind: input, shape index: {}]   ;;  %s2622_s1 = inlined_call_operand.hbm [shape: f32[384,1152], index: 1, kind: input, shape index: {}]   ;;  %s2623_s2 = inlined_call_operand.hbm [shape: f32[1,1152], index: 2, kind: input, shape index: {}]   ;;  %s2624_s3 = inlined_call_operand.hbm [shape: f32[1024,1152], index: 3, kind: output, shape index: {}]  }
   0x1   :  { %2640 = sst [smem:[#allocation22_spill]] %s2621_s0 }
   0x2   :  { %2641 = sst [smem:[#allocation23_spill]] %s2622_s1 }
   0x3   :  { %2642 = sst [smem:[#allocation24_spill]] %s2624_s3 }
   0x4   :  { %8 = vsyncpa [#allocation4], 0 }
   0x5   :  { %10 = vsyncpa [#allocation4 + $0x1], 0 }
   0x6   :  { %11 = vsyncpa [#allocation7], 0 }
   0x7   :  { %13 = vsyncpa [#allocation7 + $0x1], 0 }
   0x8   :  { %14 = vsyncpa [#allocation5], 0 }
   0x9   :  { %16 = vsyncpa [#allocation5 + $0x1], 0  ;;  %s1960_s12 = smov 0   ;;  %s1962_s13 = smov 0  }
   0xa   :  { %s1964_s14 = smov 0   ;;  %s1966_s15 = smov 0  }
   0xb   :  { %s1968_s16 = smov 0   ;;  %s1970_s17 = smov 0  }
   0xc   :  { %s1972_s18 = smov 0   ;;  %s1974_s19 = smov 0  }
   0xd   :  { %s1976_s20 = smov 0   ;;  %s1978_s21 = smov 0  }
   0xe   :  { %s1980_s22 = smov 0   ;;  %s1982_s23 = smov 0  }
   0xf   :  { %s1984_s24 = smov 0   ;;  %s1986_s25 = smov 0  }
  0x10 LB: > { %2643 = sst [smem:[#allocation13_spill]] %s1905_s20  ;;  %s2626_s26 = sadd.s32 1, %s1917_s23  ;;  %s1925_s25 = sphi %s1986_s25, %s22_s25   ;;  %s1921_s24 = sphi %s1984_s24, %s2687_s24   ;;  %s1917_s23 = sphi %s1982_s23, %s2697_s23   ;;  %s1913_s22 = sphi %s1980_s22, %s2685_s22   ;;  %s1909_s21 = sphi %s1978_s21, %s2696_s21   ;;  %s1905_s20 = sphi %s1976_s20, %s2684_s20   ;;  %s1901_s19 = sphi %s1974_s19, %s2695_s19   ;;  %s1897_s18 = sphi %s1972_s18, %s2694_s18   ;;  %s1893_s17 = sphi %s1970_s17, %s2693_s17   ;;  %s1889_s16 = sphi %s1968_s16, %s2692_s16   ;;  %s1885_s15 = sphi %s1966_s15, %s2691_s15   ;;  %s1881_s14 = sphi %s1964_s14, %s2690_s14   ;;  %s1877_s13 = sphi %s1962_s13, %s2689_s13   ;;  %s1873_s12 = sphi %s1960_s12, %s2688_s12  }
  0x11   : > { %2644 = sst [smem:[#allocation14_spill]] %s1909_s21  ;;  %p2628_p0 = scmp.eq.s32.totalorder %s1925_s25, 0 }
  0x12   : > { %2645 = sst [smem:[#allocation15_spill]] %s1913_s22  ;;  %p2034_p1 = scmp.ge.s32.totalorder %s2626_s26, 9 }
  0x13   : > { %2646 = sst [smem:[#allocation16_spill]] %s1921_s24  ;;  %p85_p2 = scmp.ne.s32.totalorder %s1893_s17, %s1889_s16 }
  0x14   : > { %p2627_p4 = scmp.lt.s32.totalorder %s1925_s25, 36  ;;  %s193_s29 = sand.u32 1, %s1925_s25  }
  0x15   : > { %p87_p5 = por %p85_p2, %p2628_p0  ;;  %s2625_s30 = sand.u32 1, %s1893_s17  }
  0x16   : > { %s1536_s4 = smul.u32 384, %s2625_s30  ;;  %s1283_s5 = sshll.u32 %s1917_s23, 7 }
  0x17   : > { %s2648_s1 = sld [smem:[#allocation23_spill]]  ;;  %p2058_p6 = pnand %p2627_p4, %p87_p5 }
  0x18   : > { %s197_s10 = scalar_lea.vmem [#allocation6], %s1536_s4  ;;  %s2065_s30 = scalar_lea.sflag [#allocation7], %s193_s29 }
  0x19   : > { %s206_s11 = sshll.u32 %s197_s10, 4  ;;  %p2634_p9 = pneg %p2058_p6  ;;  %s2062_s11 = int_to_ptr.vmem [resolvable:$true] %s206_s11 }
  0x1d   : > { %s2054_s8 = scalar_lea.hbm %s2648_s1, %s1283_s5  ;;  %s1690_s28 = scalar_lea.hbm %s2648_s1, 55296 }
  0x1e   : > { %s1685_s5 = scalar_lea.hbm %s2054_s8, 6144  ;;  %p1691_p12 = scmp.lt.u32.totalorder %s2054_s8, %s2648_s1 }
  0x1f   : > { %p1686_p8 = scmp.ne.s32.totalorder %s2054_s8, %s1685_s5  ;;  %p1692_p13 = scmp.lt.u32.totalorder %s1690_s28, %s1685_s5 }
  0x20   : > { %p1694_p5 = scmp.lt.u32.totalorder %s1685_s5, %s2054_s8 }
  0x21   : > { %p1688_p10 = pnand %p2634_p9, %p1686_p8  ;;  %p1693_p2 = por %p1692_p13, %p1691_p12 }
  0x23   : > { %p1689_p11 = pneg %p1688_p10  ;;  %p1695_p4 = por %p1694_p5, %p1693_p2 }
  0x25   : > { %p1696_p3 = pnand %p1695_p4, %p1689_p11 }
  0x27   : > { %1699 = shalt.err (!%p1696_p3)
}
  0x28   : > { %s1700_s29 = scalar_lea.vmem %s2062_s11, 6144  ;;  %s1927_s10 = smov [#allocation6]  }
  0x29   : > { %p1701_p8 = scmp.ne.s32.totalorder %s2062_s11, %s1700_s29  ;;  %s1705_s6 = sshll.u32 %s1927_s10, 4  ;;  %s1706_s6 = int_to_ptr.vmem [resolvable:$false] %s1705_s6 }
  0x2a   : > { %s1707_s26 = scalar_lea.vmem %s1706_s6, 12288  ;;  %p1708_p7 = scmp.lt.s32.totalorder %s2062_s11, %s1706_s6 }
  0x2b   : > { %p1703_p10 = pnand %p1701_p8, %p2634_p9  ;;  %p1709_p12 = scmp.lt.s32.totalorder %s1707_s26, %s1700_s29 }
  0x2d   : > { %p1704_p0 = pneg %p1703_p10  ;;  %p1710_p13 = por %p1709_p12, %p1708_p7 }
  0x2f   : > { %p1711_p2 = pnand %p1710_p13, %p1704_p0 }
  0x31   : > { %1714 = shalt.err (!%p1711_p2)
}
  0x32   : > { %s1928_s28 = smov 1152   ;;  %s1929_s5 = smov 128  }
  0x33   : > { %s1930_s7 = smov 8   ;;  %p231_p0 = scmp.lt.s32.totalorder %s1925_s25, 37 }
  0x34   : > { %1554 = dma.hbm_to_vmem [thread:$0]  (!%p2058_p6), %s2054_s8, 6144, %s2062_s11, %s2065_s30, %s1928_s28, %s1929_s5, %s1930_s7  }
  0x35   : > { %p2650_p3 = scmp.ge.s32.totalorder %s1925_s25, 1  ;;  %s2101_s29 = sadd.s32 4294967295, %s1925_s25  }
  0x36   : > { %s1277_s10 = sadd.s32 4294967294, %s1925_s25   ;;  %s2652_s6 = sadd.s32 1, %s1917_s23 }
  0x37   : > { %p2096_p4 = pnand %p2650_p3, %p231_p0  ;;  %s2699_s6 = smov (%p2034_p1, %s2652_s6), 0 }
  0x38   : > { %2653 = sst [smem:[#allocation17_spill]] %s2699_s6  ;;  %s41_s26 = sadd.s32 1, %s1921_s24 }
  0x39   : > { %s2651_s4 = scalar_select %p2096_p4, 1, 0 }
  0x3a   : > { %s50_s8 = sadd.s32 1, %s1905_s20  ;;  %s2701_s26 = smov (!%p2034_p1, %s41_s26), %s1921_s24 }
  0x3b   : > { %p57_p7 = scmp.ne.s32.totalorder %s1905_s20, %s1901_s19  ;;  %p63_p11 = scmp.ne.s32.totalorder %s1901_s19, %s1897_s18 }
  0x3c   : > { %p43_p5 = scmp.ge.s32.totalorder %s2701_s26, 4  ;;  %p64_p8 = scmp.eq.s32.totalorder %s2101_s29, 0 }
  0x3d   : > { %p2654_p10 = scmp.eq.s32.totalorder %s1925_s25, 0  ;;  %s74_s28 = ssub.s32 %s1917_s23, %s2699_s6 }
  0x3e   : > { %s2703_s26 = smov (%p43_p5, %s2701_s26), 0  ;;  %p2130_p1 = por %p64_p8, %p63_p11 }
  0x3f   : > { %p2122_p12 = por %p2654_p10, %p57_p7  ;;  %2656 = sst [smem:[#allocation18_spill]] %s2703_s26 }
  0x40   : > { %s2657_s27 = scalar_select %p2130_p1, 1, 0 }
  0x41   : > { %p76_p13 = scmp.eq.s32.totalorder %s74_s28, 0  ;;  %s45_s18 = ssub.s32 %s1921_s24, %s2703_s26 }
  0x42   : > { %p2658_p2 = scmp.ne.s32.totalorder %s1889_s16, %s1885_s15  ;;  %p48_p3 = scmp.eq.s32.totalorder %s45_s18, 0 }
  0x43   : > { %s129_s7 = sor.u32 %s74_s28, %s45_s18  ;;  %s2661_s1 = sadd.s32 1, %s1893_s17 }
  0x44   : > { %p2139_p0 = por %p2658_p2, %p64_p8  ;;  %p130_p7 = scmp.eq.s32.totalorder %s129_s7, 0 }
  0x45   : > { %s2146_s6 = scalar_select %p76_p13, %s1893_s17, %s2661_s1  }
  0x46   : > { %s2659_s5 = scalar_select %p2139_p0, 1, 0 }
  0x47   : > { %2662 = sst [smem:[#allocation20_spill]] %s2146_s6  ;;  %s132_s21 = sadd.s32 1, %s1881_s14 }
  0x48   : > { %2660 = sst [smem:[#allocation19_spill]] %s2659_s5  ;;  %p142_p11 = scmp.ne.s32.totalorder %s1881_s14, %s1877_s13 }
  0x49   : > { %s2149_s3 = scalar_select %p48_p3, %s1905_s20, %s50_s8  }
  0x4a   : > { %p143_p5 = scmp.eq.s32.totalorder %s2101_s29, 35  ;;  %p148_p10 = scmp.ne.s32.totalorder %s1877_s13, %s1873_s12 }
  0x4b   : > { %2663 = sst [smem:[#allocation21_spill]] %s2149_s3  ;;  %p149_p2 = scmp.eq.s32.totalorder %s1277_s10, 35 }
  0x4c   : > { %s2156_s26 = scalar_select %p130_p7, %s1881_s14, %s132_s21  }
  0x4d   : > { %p2158_p8 = por %p143_p5, %p142_p11  ;;  %s169_s22 = sand.u32 1, %s1905_s20  }
  0x4e   : > { %s1534_s5 = smul.u32 768, %s169_s22  ;;  %p2165_p9 = por %p149_p2, %p148_p10 }
  0x4f   : > { %s2664_s15 = scalar_select %p2158_p8, 1, 0 }
  0x50   : > { %s2665_s28 = scalar_select %p2165_p9, 1, 0 }
  0x51   : > { %s1535_s1 = smul.u32 12288, %s1921_s24  ;;  %p2666_p13 = scmp.lt.s32.totalorder %s1925_s25, 36 }
  0x52   : > { %s2668_s0 = sld [smem:[#allocation22_spill]]  ;;  %s173_s10 = scalar_lea.vmem [#allocation3], %s1534_s5 }
  0x53   : > { %p2174_p3 = pnand %p2666_p13, %p2122_p12  ;;  %s183_s3 = sshll.u32 %s173_s10, 4  ;;  %s2183_s3 = int_to_ptr.vmem [resolvable:$true] %s183_s3 }
  0x54   : > { %s2185_s11 = scalar_lea.sflag [#allocation4], %s169_s22 }
  0x55   : > { %p1717_p7 = pneg %p2174_p3 }
  0x58   : > { %s2181_s7 = scalar_lea.hbm %s2668_s0, %s1535_s1  ;;  %s1720_s18 = scalar_lea.hbm %s2668_s0, 49152 }
  0x59   : > { %s1715_s24 = scalar_lea.hbm %s2181_s7, 12288  ;;  %p1721_p10 = scmp.lt.u32.totalorder %s2181_s7, %s2668_s0 }
  0x5a   : > { %p1716_p12 = scmp.ne.s32.totalorder %s2181_s7, %s1715_s24  ;;  %p1722_p2 = scmp.lt.u32.totalorder %s1720_s18, %s1715_s24 }
  0x5b   : > { %p1724_p9 = scmp.lt.u32.totalorder %s1715_s24, %s2181_s7 }
  0x5c   : > { %p1718_p11 = pnand %p1717_p7, %p1716_p12  ;;  %p1723_p13 = por %p1722_p2, %p1721_p10 }
  0x5e   : > { %p1719_p5 = pneg %p1718_p11  ;;  %p1725_p8 = por %p1724_p9, %p1723_p13 }
  0x60   : > { %p1726_p0 = pnand %p1725_p8, %p1719_p5 }
  0x62   : > { %1729 = shalt.err (!%p1726_p0)
}
  0x63   : > { %s1730_s22 = scalar_lea.vmem %s2183_s3, 12288  ;;  %s1931_s5 = smov [#allocation3]  }
  0x64   : > { %p1731_p12 = scmp.ne.s32.totalorder %s2183_s3, %s1730_s22  ;;  %s1735_s10 = sshll.u32 %s1931_s5, 4  ;;  %s1736_s10 = int_to_ptr.vmem [resolvable:$false] %s1735_s10 }
  0x65   : > { %s1737_s20 = scalar_lea.vmem %s1736_s10, 24576  ;;  %p1738_p4 = scmp.lt.s32.totalorder %s2183_s3, %s1736_s10 }
  0x66   : > { %p1733_p11 = pnand %p1731_p12, %p1717_p7  ;;  %p1739_p10 = scmp.lt.s32.totalorder %s1737_s20, %s1730_s22 }
  0x68   : > { %p1734_p1 = pneg %p1733_p11  ;;  %p1740_p2 = por %p1739_p10, %p1738_p4 }
  0x6a   : > { %p1741_p9 = pnand %p1740_p2, %p1734_p1 }
  0x6c   : > { %1744 = shalt.err (!%p1741_p9)
}
  0x6d   : > { %s1932_s24 = smov 384   ;;  %s1933_s6 = smov 24  }
  0x6e   : > { %1551 = dma.hbm_to_vmem [thread:$0]  (!%p2174_p3), %s2181_s7, 12288, %s2183_s3, %s2185_s11, %s1932_s24, %s1932_s24, %s1933_s6  }
  0x6f   : > { %s1284_s1 = sshll.u32 %s1917_s23, 4  ;;  %s2669_s22 = sand.u32 1, %s1893_s17  }
  0x70   : > { %s2217_s5 = scalar_lea.hbm %s2623_s2, %s1284_s1  ;;  %s219_s10 = scalar_lea.vmem [#allocation8], %s2669_s22 }
  0x71   : > { %s226_s20 = sshll.u32 %s219_s10, 4  ;;  %s1745_s0 = scalar_lea.hbm %s2217_s5, 16  ;;  %s227_s20 = int_to_ptr.vmem [resolvable:$true] %s226_s20 }
  0x72   : > { %p1746_p4 = scmp.ne.s32.totalorder %s2217_s5, %s1745_s0  ;;  %p2670_p1 = pneg %p2058_p6 }
  0x73   : > { %s1750_s7 = scalar_lea.hbm %s2623_s2, 144  ;;  %p1751_p3 = scmp.lt.u32.totalorder %s2217_s5, %s2623_s2 }
  0x74   : > { %p1748_p0 = pnand %p1746_p4, %p2670_p1  ;;  %p1752_p7 = scmp.lt.u32.totalorder %s1750_s7, %s1745_s0 }
  0x75   : > { %p1754_p13 = scmp.lt.u32.totalorder %s1745_s0, %s2217_s5 }
  0x76   : > { %p1749_p8 = pneg %p1748_p0  ;;  %p1753_p5 = por %p1752_p7, %p1751_p3 }
  0x78   : > { %p1755_p12 = por %p1754_p13, %p1753_p5 }
  0x7a   : > { %p1756_p11 = pnand %p1755_p12, %p1749_p8 }
  0x7c   : > { %1759 = shalt.err (!%p1756_p11)
}
  0x7d   : > { %s1760_s6 = scalar_lea.vmem %s227_s20, 16  ;;  %p2671_p2 = pmov %p2670_p1 }
  0x7e   : > { %p1761_p10 = scmp.ne.s32.totalorder %s227_s20, %s1760_s6  ;;  %s1934_s1 = smov [#allocation8]  }
  0x7f   : > { %s1765_s21 = sshll.u32 %s1934_s1, 4  ;;  %s1766_s21 = int_to_ptr.vmem [resolvable:$false] %s1765_s21 }
  0x80   : > { %p1763_p9 = pnand %p1761_p10, %p2671_p2  ;;  %s1767_s18 = scalar_lea.vmem %s1766_s21, 32 }
  0x81   : > { %p1768_p1 = scmp.lt.s32.totalorder %s227_s20, %s1766_s21  ;;  %p1769_p0 = scmp.lt.s32.totalorder %s1767_s18, %s1760_s6 }
  0x82   : > { %p1764_p4 = pneg %p1763_p9 }
  0x83   : > { %p1770_p3 = por %p1769_p0, %p1768_p1 }
  0x85   : > { %p1771_p7 = pnand %p1770_p3, %p1764_p4 }
  0x87   : > { %1774 = shalt.err (!%p1771_p7)
}
  0x88   : > { %1557 = dma.hbm_to_vmem [thread:$0]  (!%p2058_p6), %s2217_s5, 16, %s227_s20, %s2065_s30  }
  0x89   : > { %p2672_p8 = scmp.ne.s32.totalorder %s2651_s4, 0 }
  0x8a   : > { %s237_s0 = sand.u32 (!%p2672_p8), 1, %s1901_s19   ;;  %p2673_p5 = scmp.ne.s32.totalorder (!%p2672_p8), %s2657_s27, 0 }
  0x8b   : > { %235 = sbr.rel (%p2672_p8) target bundleno = 547 (0x223), region = 32  ;;  %s238_s10 = scalar_lea.sflag (!%p2672_p8), [#allocation4], %s237_s0 }
  0x8c   : > { %s1537_s22 = smul.u32 (!%p2672_p8), 768, %s237_s0 }
  0x8e   : > { %s2244_s3 = scalar_lea.vmem (!%p2672_p8), [#allocation3], %s1537_s22 }
  0x92   : > { %1860 = dma.done.wait (%p2673_p5), %s238_s10, 12288  }
  0x93   : > { %1862 = vsyncadd (%p2673_p5), %s238_s10, 4294955008  ;;  %s2674_s9 = sld [smem:[#allocation19_spill]]  ;;  %s246_s30 = sand.u32 1, %s2101_s29  }
  0x94   : > { %s248_s5 = sand.u32 1, %s1889_s16   ;;  %s247_s20 = scalar_lea.sflag [#allocation7], %s246_s30 }
  0x95   : > { %s1538_s4 = smul.u32 384, %s248_s5 }
  0x97   : > { %s2254_s8 = scalar_lea.vmem [#allocation6], %s1538_s4 }
  0x99   : > { %p2675_p6 = scmp.ne.s32.totalorder %s2674_s9, 0 }
  0x9b   : > { %1864 = dma.done.wait (%p2675_p6), %s247_s20, 6160  }
  0x9c   : > { %1866 = vsyncadd (%p2675_p6), %s247_s20, 4294961136  ;;  %v1935_v0 = vmov 0.0|0.0   ;;  %v458_v1 = vld [vmem:[%s2254_s8] sm:$0xff]  ;;  %v459_v2 = vld [vmem:[%s2254_s8 + $0x8] sm:$0xff]  ;;  %s287_s29 = sand.u32 1, %s1877_s13   ;;  %s258_s7 = scalar_lea.vmem [#allocation8], %s248_s5 }
  0x9d   : > { %1422 = vmatprep.subr.bf16.mxu0 %v1935_v0  ;;  %1502 = vmatprep.subr.bf16.mxu1 %v1935_v0  ;;  %v460_v3 = vld [vmem:[%s2254_s8 + $0x10] sm:$0xff]  ;;  %v1423_v4 = vpack.c.bf16 %v459_v2, %v458_v1  ;;  %v461_v5 = vld [vmem:[%s2254_s8 + $0x18] sm:$0xff]  ;;  %v462_v7 = vld [vmem:[%s2254_s8 + $0x20] sm:$0xff]  ;;  %s1286_s27 = sshll.u32 %s287_s29, 8  ;;  %s2676_s24 = sld [smem:[#allocation15_spill]] }
  0x9e   : > { %v1426_v6 = vpack.c.bf16 %v461_v5, %v460_v3  ;;  %v463_v8 = vld [vmem:[%s2254_s8 + $0x28] sm:$0xff]  ;;  %v464_v10 = vld [vmem:[%s2254_s8 + $0x30] sm:$0xff]  ;;  %v465_v11 = vld [vmem:[%s2254_s8 + $0x38] sm:$0xff]  ;;  %s2461_s11 = scalar_lea.vmem [#allocation9], %s1286_s27  ;;  %s2677_s6 = sld [smem:[#allocation14_spill]] }
  0x9f   : > { %1424 = vmatpush1.bf16.msra.mxu0 %v1423_v4  ;;  %1518 = vmatpush1.bf16.msra.mxu1 %v1423_v4  ;;  %v1429_v9 = vpack.c.bf16 %v463_v8, %v462_v7  ;;  %v363_v12 = vld [vmem:[%s2244_s3 + $0x8] sm:$0xff]  ;;  %v1432_v13 = vpack.c.bf16 %v465_v11, %v464_v10  ;;  %v466_v15 = vld [vmem:[%s2254_s8 + $0x40] sm:$0xff]  ;;  %v468_v18 = vld [vmem:[%s2254_s8 + $0x50] sm:$0xff]  ;;  %s1142_s0 = sshll.u32 %s2461_s11, 4  ;;  %s2545_s30 = scalar_lea.sflag [#allocation5], %s287_s29  ;;  %s2537_s0 = int_to_ptr.vmem [resolvable:$true] %s1142_s0 }
  0xa0   : > { %1425 = vmatprep.subr.bf16.mxu0 %v1935_v0  ;;  %1503 = vmatprep.subr.bf16.mxu1 %v1935_v0  ;;  %v435_v14 = vld [vmem:[%s2244_s3 + $0x248] sm:$0xff]  ;;  %v469_v19 = vld [vmem:[%s2254_s8 + $0x58] sm:$0xff]  ;;  %v470_v21 = vld [vmem:[%s2254_s8 + $0x60] sm:$0xff]  ;;  %s1775_s5 = scalar_lea.vmem %s2537_s0, 4096  ;;  %p2679_p12 = scmp.ne.s32.totalorder %s2664_s15, 0 }
  0xa1   : > { %v467_v16 = vld [vmem:[%s2254_s8 + $0x48] sm:$0xff]  ;;  %570 = vmatprep.mubr.f32.mxu0 %v363_v12  ;;  %690 = vmatprep.mubr.f32.mxu1 %v435_v14  ;;  %v1438_v20 = vpack.c.bf16 %v469_v19, %v468_v18  ;;  %v472_v24 = vld [vmem:[%s2254_s8 + $0x70] sm:$0xff]  ;;  %v473_v25 = vld [vmem:[%s2254_s8 + $0x78] sm:$0xff]  ;;  %p1776_p13 = scmp.ne.s32.totalorder %s2537_s0, %s1775_s5  ;;  %s1936_s4 = smov [#allocation9]  }
  0xa2   : > { %v1435_v17 = vpack.c.bf16 %v467_v16, %v466_v15  ;;  %v471_v22 = vld [vmem:[%s2254_s8 + $0x68] sm:$0xff]  ;;  %v1444_v26 = vpack.c.bf16 %v473_v25, %v472_v24  ;;  %v474_v27 = vld [vmem:[%s2254_s8 + $0x80] sm:$0xff]  ;;  %v476_v30 = vld [vmem:[%s2254_s8 + $0x90] sm:$0xff]  ;;  %s1779_s20 = sshll.u32 %s1936_s4, 4  ;;  %s1780_s20 = int_to_ptr.vmem [resolvable:$false] %s1779_s20 }
  0xa3   : > { %1427 = vmatpush1.bf16.msra.mxu0 %v1426_v6  ;;  %1519 = vmatpush1.bf16.msra.mxu1 %v1426_v6  ;;  %v1441_v23 = vpack.c.bf16 %v471_v22, %v470_v21  ;;  %v475_v28 = vld [vmem:[%s2254_s8 + $0x88] sm:$0xff]  ;;  %v477_v31 = vld [vmem:[%s2254_s8 + $0x98] sm:$0xff]  ;;  %v478_v33 = vld [vmem:[%s2254_s8 + $0xa0] sm:$0xff]  ;;  %s1539_s1 = smul.u32 288, %s2676_s24  ;;  %p1777_p11 = pnand %p1776_p13, %p2679_p12 }
  0xa4   : > { %1428 = vmatprep.subr.bf16.mxu0 %v1935_v0  ;;  %1504 = vmatprep.subr.bf16.mxu1 %v1935_v0  ;;  %v1447_v29 = vpack.c.bf16 %v475_v28, %v474_v27  ;;  %v1450_v32 = vpack.c.bf16 %v477_v31, %v476_v30  ;;  %v479_v34 = vld [vmem:[%s2254_s8 + $0xa8] sm:$0xff]  ;;  %v480_v36 = vld [vmem:[%s2254_s8 + $0xb0] sm:$0xff]  ;;  %v481_v37 = vld [vmem:[%s2254_s8 + $0xb8] sm:$0xff]  ;;  %p1782_p2 = scmp.lt.s32.totalorder %s2537_s0, %s1780_s20 }
  0xa5   : > { %v1453_v35 = vpack.c.bf16 %v479_v34, %v478_v33  ;;  %v1456_v38 = vpack.c.bf16 %v481_v37, %v480_v36  ;;  %v482_v39 = vld [vmem:[%s2254_s8 + $0xc0] sm:$0xff]  ;;  %v483_v40 = vld [vmem:[%s2254_s8 + $0xc8] sm:$0xff]  ;;  %v484_v42 = vld [vmem:[%s2254_s8 + $0xd0] sm:$0xff]  ;;  %s1139_s21 = sadd.s32 %s2677_s6, %s1539_s1  ;;  %p1778_p10 = pneg %p1777_p11 }
  0xa6   : > { %v1459_v41 = vpack.c.bf16 %v483_v40, %v482_v39  ;;  %v485_v43 = vld [vmem:[%s2254_s8 + $0xd8] sm:$0xff]  ;;  %v486_v45 = vld [vmem:[%s2254_s8 + $0xe0] sm:$0xff]  ;;  %v487_v46 = vld [vmem:[%s2254_s8 + $0xe8] sm:$0xff]  ;;  %s1291_s18 = sshll.u32 %s1139_s21, 7 }
  0xa7   : > { %1430 = vmatpush1.bf16.msra.mxu0 %v1429_v9  ;;  %1520 = vmatpush1.bf16.msra.mxu1 %v1429_v9  ;;  %v1462_v44 = vpack.c.bf16 %v485_v43, %v484_v42  ;;  %v1465_v47 = vpack.c.bf16 %v487_v46, %v486_v45  ;;  %v488_v48 = vld [vmem:[%s2254_s8 + $0xf0] sm:$0xff]  ;;  %v489_v49 = vld [vmem:[%s2254_s8 + $0xf8] sm:$0xff]  ;;  %v490_v50 = vld [vmem:[%s2254_s8 + $0x100] sm:$0xff] }
  0xa8   : > { %1431 = vmatprep.subr.bf16.mxu0 %v1935_v0  ;;  %1505 = vmatprep.subr.bf16.mxu1 %v1935_v0  ;;  %v491_v51 = vld [vmem:[%s2254_s8 + $0x108] sm:$0xff]  ;;  %v1468_v52 = vpack.c.bf16 %v489_v49, %v488_v48  ;;  %v492_v54 = vld [vmem:[%s2254_s8 + $0x110] sm:$0xff]  ;;  %v493_v55 = vld [vmem:[%s2254_s8 + $0x118] sm:$0xff] }
  0xa9   : > { %v1470_v53 = vpack.c.bf16 %v491_v51, %v490_v50  ;;  %v362_v56 = vld [vmem:[%s2244_s3] sm:$0xff]  ;;  %v1474_v59 = vpack.c.bf16 %v493_v55, %v492_v54  ;;  %v495_v62 = vld [vmem:[%s2254_s8 + $0x128] sm:$0xff]  ;;  %v365_v63 = vld [vmem:[%s2244_s3 + $0x18] sm:$0xff] }
  0xaa   : > { %v434_v57 = vld [vmem:[%s2244_s3 + $0x240] sm:$0xff]  ;;  %v369_v1 = vld [vmem:[%s2244_s3 + $0x38] sm:$0xff]  ;;  %v496_v4 = vld [vmem:[%s2254_s8 + $0x130] sm:$0xff] }
  0xab   : > { %1433 = vmatpush1.bf16.msra.mxu0 %v1432_v13  ;;  %1521 = vmatpush1.bf16.msra.mxu1 %v1432_v13  ;;  %v366_v58 = vld [vmem:[%s2244_s3 + $0x20] sm:$0xff]  ;;  %v441_v3 = vld [vmem:[%s2244_s3 + $0x278] sm:$0xff]  ;;  %v368_v6 = vld [vmem:[%s2244_s3 + $0x30] sm:$0xff] }
  0xac   : > { %1434 = vmatprep.subr.bf16.mxu0 %v1935_v0  ;;  %1506 = vmatprep.subr.bf16.mxu1 %v1935_v0  ;;  %v438_v60 = vld [vmem:[%s2244_s3 + $0x260] sm:$0xff]  ;;  %v497_v5 = vld [vmem:[%s2254_s8 + $0x138] sm:$0xff]  ;;  %v440_v7 = vld [vmem:[%s2244_s3 + $0x270] sm:$0xff] }
  0xad   : > { %v494_v61 = vld [vmem:[%s2254_s8 + $0x120] sm:$0xff]  ;;  %v372_v8 = vld [vmem:[%s2244_s3 + $0x50] sm:$0xff]  ;;  %v1482_v9 = vpack.c.bf16 %v497_v5, %v496_v4  ;;  %v499_v12 = vld [vmem:[%s2254_s8 + $0x148] sm:$0xff] }
  0xae   : > { %v1478_v2 = vpack.c.bf16 %v495_v62, %v494_v61  ;;  %v444_v10 = vld [vmem:[%s2244_s3 + $0x290] sm:$0xff]  ;;  %v498_v11 = vld [vmem:[%s2254_s8 + $0x140] sm:$0xff]  ;;  %v371_v13 = vld [vmem:[%s2244_s3 + $0x48] sm:$0xff] }
  0xaf   : > { %1436 = vmatpush1.bf16.msra.mxu0 %v1435_v17  ;;  %1522 = vmatpush1.bf16.msra.mxu1 %v1435_v17  ;;  %v443_v14 = vld [vmem:[%s2244_s3 + $0x288] sm:$0xff]  ;;  %v1486_v16 = vpack.c.bf16 %v499_v12, %v498_v11  ;;  %v500_v18 = vld [vmem:[%s2254_s8 + $0x150] sm:$0xff]  ;;  %v501_v19 = vld [vmem:[%s2254_s8 + $0x158] sm:$0xff] }
  0xb0   : > { %1437 = vmatprep.subr.bf16.mxu0 %v1935_v0  ;;  %1507 = vmatprep.subr.bf16.mxu1 %v1935_v0  ;;  %v375_v15 = vld [vmem:[%s2244_s3 + $0x68] sm:$0xff]  ;;  %v446_v21 = vld [vmem:[%s2244_s3 + $0x2a0] sm:$0xff]  ;;  %v377_v27 = vld [vmem:[%s2244_s3 + $0x78] sm:$0xff] }
  0xb1   : > { %v447_v17 = vld [vmem:[%s2244_s3 + $0x2a8] sm:$0xff]  ;;  %v378_v22 = vld [vmem:[%s2244_s3 + $0x80] sm:$0xff]  ;;  %v449_v28 = vld [vmem:[%s2244_s3 + $0x2b8] sm:$0xff] }
  0xb2   : > { %v450_v24 = vld [vmem:[%s2244_s3 + $0x2c0] sm:$0xff]  ;;  %v453_v31 = vld [vmem:[%s2244_s3 + $0x2d8] sm:$0xff]  ;;  %v380_v34 = vld [vmem:[%s2244_s3 + $0x90] sm:$0xff] }
  0xb3   : > { %1439 = vmatpush1.bf16.msra.mxu0 %v1438_v20  ;;  %1523 = vmatpush1.bf16.msra.mxu1 %v1438_v20  ;;  %v374_v20 = vld [vmem:[%s2244_s3 + $0x60] sm:$0xff]  ;;  %v505_v33 = vld [vmem:[%s2254_s8 + $0x178] sm:$0xff]  ;;  %v384_v36 = vld [vmem:[%s2244_s3 + $0xb0] sm:$0xff] }
  0xb4   : > { %1440 = vmatprep.subr.bf16.mxu0 %v1935_v0  ;;  %1508 = vmatprep.subr.bf16.mxu1 %v1935_v0  ;;  %v502_v25 = vld [vmem:[%s2254_s8 + $0x160] sm:$0xff]  ;;  %v383_v39 = vld [vmem:[%s2244_s3 + $0xa8] sm:$0xff]  ;;  %v364_v42 = vld [vmem:[%s2244_s3 + $0x10] sm:$0xff] }
  0xb5   : > { %v455_v40 = vld [vmem:[%s2244_s3 + $0x2e8] sm:$0xff]  ;;  %v386_v43 = vld [vmem:[%s2244_s3 + $0xc0] sm:$0xff]  ;;  %v373_v48 = vld [vmem:[%s2244_s3 + $0x58] sm:$0xff] }
  0xb6   : > { %v390_v45 = vld [vmem:[%s2244_s3 + $0xe0] sm:$0xff]  ;;  %v393_v49 = vld [vmem:[%s2244_s3 + $0xf8] sm:$0xff]  ;;  %v376_v50 = vld [vmem:[%s2244_s3 + $0x70] sm:$0xff] }
  0xb7   : > { %1442 = vmatpush1.bf16.msra.mxu0 %v1441_v23  ;;  %1524 = vmatpush1.bf16.msra.mxu1 %v1441_v23  ;;  %v1490_v23 = vpack.c.bf16 %v501_v19, %v500_v18  ;;  %v370_v46 = vld [vmem:[%s2244_s3 + $0x40] sm:$0xff]  ;;  %v392_v51 = vld [vmem:[%s2244_s3 + $0xf0] sm:$0xff]  ;;  %v395_v55 = vld [vmem:[%s2244_s3 + $0x108] sm:$0xff] }
  0xb8   : > { %1443 = vmatprep.subr.bf16.mxu0 %v1935_v0  ;;  %1509 = vmatprep.subr.bf16.mxu1 %v1935_v0  ;;  %v382_v54 = vld [vmem:[%s2244_s3 + $0xa0] sm:$0xff]  ;;  %v403_v4 = vld [vmem:[%s2244_s3 + $0x148] sm:$0xff]  ;;  %v408_v5 = vld [vmem:[%s2244_s3 + $0x170] sm:$0xff] }
  0xb9   : > { %v402_v61 = vld [vmem:[%s2244_s3 + $0x140] sm:$0xff]  ;;  %v415_v12 = vld [vmem:[%s2244_s3 + $0x1a8] sm:$0xff]  ;;  %v424_v18 = vld [vmem:[%s2244_s3 + $0x1f0] sm:$0xff] }
  0xba   : > { %v394_v62 = vld [vmem:[%s2244_s3 + $0x100] sm:$0xff]  ;;  %v416_v19 = vld [vmem:[%s2244_s3 + $0x1b0] sm:$0xff] }
  0xbb   : > { %1445 = vmatpush1.bf16.msra.mxu0 %v1444_v26  ;;  %1525 = vmatpush1.bf16.msra.mxu1 %v1444_v26  ;;  %v503_v26 = vld [vmem:[%s2254_s8 + $0x168] sm:$0xff]  ;;  %v410_v11 = vld [vmem:[%s2244_s3 + $0x180] sm:$0xff] }
  0xbc   : > { %1446 = vmatprep.subr.bf16.mxu0 %v1935_v0  ;;  %1510 = vmatprep.subr.bf16.mxu1 %v1935_v0  ;;  %v1494_v30 = vpack.c.bf16 %v503_v26, %v502_v25  ;;  %v423_v25 = vld [vmem:[%s2244_s3 + $0x1e8] sm:$0xff]  ;;  %v436_v26 = vld [vmem:[%s2244_s3 + $0x250] sm:$0xff] }
  0xbf   : > { %1448 = vmatpush1.bf16.msra.mxu0 %v1447_v29  ;;  %1526 = vmatpush1.bf16.msra.mxu1 %v1447_v29  ;;  %v381_v29 = vld [vmem:[%s2244_s3 + $0x98] sm:$0xff] }
  0xc0   : > { %1449 = vmatprep.subr.bf16.mxu0 %v1935_v0  ;;  %1511 = vmatprep.subr.bf16.mxu1 %v1935_v0 }
  0xc3   : > { %1451 = vmatpush1.bf16.msra.mxu0 %v1450_v32  ;;  %1527 = vmatpush1.bf16.msra.mxu1 %v1450_v32  ;;  %v504_v32 = vld [vmem:[%s2254_s8 + $0x170] sm:$0xff]  ;;  %s1781_s8 = scalar_lea.vmem %s1780_s20, 8192 }
  0xc4   : > { %1452 = vmatprep.subr.bf16.mxu0 %v1935_v0  ;;  %1512 = vmatprep.subr.bf16.mxu1 %v1935_v0  ;;  %v1498_v37 = vpack.c.bf16 %v505_v33, %v504_v32  ;;  %v445_v32 = vld [vmem:[%s2244_s3 + $0x298] sm:$0xff]  ;;  %p1783_p9 = scmp.lt.s32.totalorder %s1781_s8, %s1775_s5 }
  0xc5   : > { %v429_v33 = vld [vmem:[%s2244_s3 + $0x218] sm:$0xff] }
  0xc6   : > { %p1784_p4 = por %p1783_p9, %p1782_p2 }
  0xc7   : > { %1454 = vmatpush1.bf16.msra.mxu0 %v1453_v35  ;;  %1528 = vmatpush1.bf16.msra.mxu1 %v1453_v35  ;;  %v452_v35 = vld [vmem:[%s2244_s3 + $0x2d0] sm:$0xff] }
  0xc8   : > { %1455 = vmatprep.subr.bf16.mxu0 %v1935_v0  ;;  %1513 = vmatprep.subr.bf16.mxu1 %v1935_v0  ;;  %p1785_p1 = pnand %p1784_p4, %p1778_p10 }
  0xcb   : > { %1457 = vmatpush1.bf16.msra.mxu0 %v1456_v38  ;;  %1529 = vmatpush1.bf16.msra.mxu1 %v1456_v38  ;;  %v456_v38 = vld [vmem:[%s2244_s3 + $0x2f0] sm:$0xff] }
  0xcc   : > { %1458 = vmatprep.subr.bf16.mxu0 %v1935_v0  ;;  %1514 = vmatprep.subr.bf16.mxu1 %v1935_v0 }
  0xcf   : > { %1460 = vmatpush1.bf16.msra.mxu0 %v1459_v41  ;;  %1530 = vmatpush1.bf16.msra.mxu1 %v1459_v41  ;;  %v387_v41 = vld [vmem:[%s2244_s3 + $0xc8] sm:$0xff] }
  0xd0   : > { %1461 = vmatprep.subr.bf16.mxu0 %v1935_v0  ;;  %1515 = vmatprep.subr.bf16.mxu1 %v1935_v0 }
  0xd3   : > { %1463 = vmatpush1.bf16.msra.mxu0 %v1462_v44  ;;  %1531 = vmatpush1.bf16.msra.mxu1 %v1462_v44  ;;  %v367_v44 = vld [vmem:[%s2244_s3 + $0x28] sm:$0xff] }
  0xd4   : > { %1464 = vmatprep.subr.bf16.mxu0 %v1935_v0  ;;  %1516 = vmatprep.subr.bf16.mxu1 %v1935_v0 }
  0xd7   : > { %1466 = vmatpush1.bf16.msra.mxu0 %v1465_v47  ;;  %1532 = vmatpush1.bf16.msra.mxu1 %v1465_v47  ;;  %v389_v47 = vld [vmem:[%s2244_s3 + $0xd8] sm:$0xff] }
  0xd8   : > { %1467 = vmatprep.subr.bf16.mxu0 %v1935_v0  ;;  %1517 = vmatprep.subr.bf16.mxu1 %v1935_v0  ;;  %v437_v0 = vld [vmem:[%s2244_s3 + $0x258] sm:$0xff] }
  0xdb   : > { %1469 = vmatpush1.bf16.msra.mxu0 %v1468_v52  ;;  %1533 = vmatpush1.bf16.msra.mxu1 %v1468_v52  ;;  %v379_v52 = vld [vmem:[%s2244_s3 + $0x88] sm:$0xff] }
  0xdc   : > { %1471 = vmatprep.subr.bf16.mxu1 %v1470_v53 }
  0xde   : > { %571 = vmatmul.mubr.f32.vlgmr.msra.gmra.mrb[0].mxu0 %v362_v56  ;;  %691 = vmatmul.mubr.f32.vlgmr.msra.gmra.mrb[0].mxu1 %v434_v57  ;;  %v385_v56 = vld [vmem:[%s2244_s3 + $0xb8] sm:$0xff]  ;;  %v399_v57 = vld [vmem:[%s2244_s3 + $0x128] sm:$0xff] }
  0xdf   : > { %1473 = vmatpush3.bf16.msra.mxu1 %v1470_v53  ;;  %575 = vmatprep.mubr.f32.mxu0 %v366_v58  ;;  %v396_v53 = vld [vmem:[%s2244_s3 + $0x110] sm:$0xff] }
  0xe0   : > { %695 = vmatprep.mubr.f32.mxu1 %v438_v60  ;;  %1475 = vmatprep.subr.bf16.mxu1 %v1474_v59  ;;  %v388_v58 = vld [vmem:[%s2244_s3 + $0xd0] sm:$0xff]  ;;  %v391_v60 = vld [vmem:[%s2244_s3 + $0xe8] sm:$0xff] }
  0xe2   : > { %576 = vmatmul.mubr.f32.gmra.mrb[2].mxu0 %v365_v63  ;;  %696 = vmatmul.mubr.f32.gmra.mrb[2].mxu1 %v437_v0  ;;  %v401_v63 = vld [vmem:[%s2244_s3 + $0x138] sm:$0xff] }
  0xe3   : > { %1477 = vmatpush3.bf16.msra.mxu1 %v1474_v59  ;;  %580 = vmatprep.mubr.f32.mxu0 %v369_v1  ;;  %v398_v59 = vld [vmem:[%s2244_s3 + $0x120] sm:$0xff]  ;;  %v397_v0 = vld [vmem:[%s2244_s3 + $0x118] sm:$0xff] }
  0xe4   : > { %700 = vmatprep.mubr.f32.mxu1 %v441_v3  ;;  %1479 = vmatprep.subr.bf16.mxu1 %v1478_v2  ;;  %v405_v1 = vld [vmem:[%s2244_s3 + $0x158] sm:$0xff]  ;;  %v404_v3 = vld [vmem:[%s2244_s3 + $0x150] sm:$0xff] }
  0xe6   : > { %581 = vmatmul.mubr.f32.gmra.mrb[4].mxu0 %v368_v6  ;;  %701 = vmatmul.mubr.f32.gmra.mrb[4].mxu1 %v440_v7  ;;  %v406_v6 = vld [vmem:[%s2244_s3 + $0x160] sm:$0xff]  ;;  %v407_v7 = vld [vmem:[%s2244_s3 + $0x168] sm:$0xff] }
  0xe7   : > { %1481 = vmatpush3.bf16.msra.mxu1 %v1478_v2  ;;  %585 = vmatprep.mubr.f32.mxu0 %v372_v8  ;;  %v400_v2 = vld [vmem:[%s2244_s3 + $0x130] sm:$0xff]  ;;  %v409_v8 = vld [vmem:[%s2244_s3 + $0x178] sm:$0xff] }
  0xe8   : > { %705 = vmatprep.mubr.f32.mxu1 %v444_v10  ;;  %1483 = vmatprep.subr.bf16.mxu1 %v1482_v9  ;;  %v412_v10 = vld [vmem:[%s2244_s3 + $0x190] sm:$0xff] }
  0xea   : > { %586 = vmatmul.mubr.f32.gmra.mrb[6].mxu0 %v371_v13  ;;  %706 = vmatmul.mubr.f32.gmra.mrb[6].mxu1 %v443_v14  ;;  %v414_v13 = vld [vmem:[%s2244_s3 + $0x1a0] sm:$0xff] }
  0xeb   : > { %1485 = vmatpush3.bf16.msra.mxu1 %v1482_v9  ;;  %590 = vmatprep.mubr.f32.mxu0 %v375_v15  ;;  %v411_v9 = vld [vmem:[%s2244_s3 + $0x188] sm:$0xff]  ;;  %v418_v14 = vld [vmem:[%s2244_s3 + $0x1c0] sm:$0xff]  ;;  %v413_v15 = vld [vmem:[%s2244_s3 + $0x198] sm:$0xff] }
  0xec   : > { %710 = vmatprep.mubr.f32.mxu1 %v447_v17  ;;  %1487 = vmatprep.subr.bf16.mxu1 %v1486_v16  ;;  %v417_v17 = vld [vmem:[%s2244_s3 + $0x1b8] sm:$0xff] }
  0xee   : > { %591 = vmatmul.mubr.f32.gmra.mrb[8].mxu0 %v374_v20  ;;  %711 = vmatmul.mubr.f32.gmra.mrb[8].mxu1 %v446_v21  ;;  %v427_v20 = vld [vmem:[%s2244_s3 + $0x208] sm:$0xff]  ;;  %v420_v21 = vld [vmem:[%s2244_s3 + $0x1d0] sm:$0xff] }
  0xef   : > { %1489 = vmatpush3.bf16.msra.mxu1 %v1486_v16  ;;  %595 = vmatprep.mubr.f32.mxu0 %v378_v22  ;;  %v421_v16 = vld [vmem:[%s2244_s3 + $0x1d8] sm:$0xff]  ;;  %v430_v22 = vld [vmem:[%s2244_s3 + $0x220] sm:$0xff] }
  0xf0   : > { %715 = vmatprep.mubr.f32.mxu1 %v450_v24  ;;  %1491 = vmatprep.subr.bf16.mxu1 %v1490_v23  ;;  %v433_v24 = vld [vmem:[%s2244_s3 + $0x238] sm:$0xff] }
  0xf2   : > { %596 = vmatmul.mubr.f32.gmra.mrb[10].mxu0 %v377_v27  ;;  %716 = vmatmul.mubr.f32.gmra.mrb[10].mxu1 %v449_v28  ;;  %v422_v27 = vld [vmem:[%s2244_s3 + $0x1e0] sm:$0xff]  ;;  %v439_v28 = vld [vmem:[%s2244_s3 + $0x268] sm:$0xff] }
  0xf3   : > { %1493 = vmatpush3.bf16.msra.mxu1 %v1490_v23  ;;  %600 = vmatprep.mubr.f32.mxu0 %v381_v29  ;;  %v419_v23 = vld [vmem:[%s2244_s3 + $0x1c8] sm:$0xff]  ;;  %v426_v29 = vld [vmem:[%s2244_s3 + $0x200] sm:$0xff] }
  0xf4   : > { %720 = vmatprep.mubr.f32.mxu1 %v453_v31  ;;  %1495 = vmatprep.subr.bf16.mxu1 %v1494_v30  ;;  %v425_v31 = vld [vmem:[%s2244_s3 + $0x1f8] sm:$0xff] }
  0xf6   : > { %601 = vmatmul.mubr.f32.gmra.mrb[12].mxu0 %v380_v34  ;;  %721 = vmatmul.mubr.f32.gmra.mrb[12].mxu1 %v452_v35  ;;  %v448_v34 = vld [vmem:[%s2244_s3 + $0x2b0] sm:$0xff] }
  0xf7   : > { %1497 = vmatpush3.bf16.msra.mxu1 %v1494_v30  ;;  %605 = vmatprep.mubr.f32.mxu0 %v384_v36  ;;  %v442_v30 = vld [vmem:[%s2244_s3 + $0x280] sm:$0xff]  ;;  %v428_v35 = vld [vmem:[%s2244_s3 + $0x210] sm:$0xff]  ;;  %v451_v36 = vld [vmem:[%s2244_s3 + $0x2c8] sm:$0xff] }
  0xf8   : > { %725 = vmatprep.mubr.f32.mxu1 %v456_v38  ;;  %1499 = vmatprep.subr.bf16.mxu1 %v1498_v37  ;;  %v454_v38 = vld [vmem:[%s2244_s3 + $0x2e0] sm:$0xff] }
  0xfa   : > { %606 = vmatmul.mubr.f32.gmra.mrb[14].mxu0 %v383_v39  ;;  %726 = vmatmul.mubr.f32.gmra.mrb[14].mxu1 %v455_v40  ;;  %v431_v39 = vld [vmem:[%s2244_s3 + $0x228] sm:$0xff]  ;;  %v457_v40 = vld [vmem:[%s2244_s3 + $0x2f8] sm:$0xff] }
  0xfb   : > { %1501 = vmatpush3.bf16.msra.mxu1 %v1498_v37  ;;  %610 = vmatprep.mubr.f32.mxu0 %v387_v41  ;;  %v432_v37 = vld [vmem:[%s2244_s3 + $0x230] sm:$0xff]  ;;  %s2678_s3 = sld [smem:[#allocation24_spill]] }
  0xfc   : > { %1374 = vmatprep.mubr.f32.mxu1 %v364_v42 }
  0xfe   : > { %611 = vmatmul.mubr.f32.gmra.mrb[16].mxu0 %v386_v43  ;;  %1375 = vmatmul.mubr.f32.vlgmr.msra.gmra.mrb[16].mxu1 %v367_v44 }
  0xff   : > { %615 = vmatprep.mubr.f32.mxu0 %v390_v45  ;;  %1377 = vmatprep.mubr.f32.mxu1 %v370_v46 }
 0x101   : > { %s2533_s9 = scalar_lea.hbm %s2678_s3, %s1291_s18 }
 0x102   : > { %616 = vmatmul.mubr.f32.gmra.mrb[18].mxu0 %v389_v47  ;;  %1378 = vmatmul.mubr.f32.gmra.mrb[18].mxu1 %v373_v48 }
 0x103   : > { %620 = vmatprep.mubr.f32.mxu0 %v393_v49  ;;  %1380 = vmatprep.mubr.f32.mxu1 %v376_v50 }
 0x106   : > { %621 = vmatmul.mubr.f32.gmra.mrb[20].mxu0 %v392_v51  ;;  %1381 = vmatmul.mubr.f32.gmra.mrb[20].mxu1 %v379_v52 }
 0x107   : > { %625 = vmatprep.mubr.f32.mxu0 %v396_v53  ;;  %1383 = vmatprep.mubr.f32.mxu1 %v382_v54 }
 0x10a   : > { %626 = vmatmul.mubr.f32.gmra.mrb[22].mxu0 %v395_v55  ;;  %1384 = vmatmul.mubr.f32.gmra.mrb[22].mxu1 %v385_v56 }
 0x10b   : > { %630 = vmatprep.mubr.f32.mxu0 %v399_v57  ;;  %1386 = vmatprep.mubr.f32.mxu1 %v388_v58 }
 0x10e   : > { %631 = vmatmul.mubr.f32.gmra.mrb[24].mxu0 %v398_v59  ;;  %1387 = vmatmul.mubr.f32.gmra.mrb[24].mxu1 %v391_v60 }
 0x10f   : > { %635 = vmatprep.mubr.f32.mxu0 %v402_v61  ;;  %1389 = vmatprep.mubr.f32.mxu1 %v394_v62 }
 0x112   : > { %636 = vmatmul.mubr.f32.gmra.mrb[26].mxu0 %v401_v63  ;;  %1390 = vmatmul.mubr.f32.gmra.mrb[26].mxu1 %v397_v0 }
 0x113   : > { %640 = vmatprep.mubr.f32.mxu0 %v405_v1  ;;  %1392 = vmatprep.mubr.f32.mxu1 %v400_v2 }
 0x116   : > { %641 = vmatmul.mubr.f32.gmra.mrb[28].mxu0 %v404_v3  ;;  %1393 = vmatmul.mubr.f32.gmra.mrb[28].mxu1 %v403_v4 }
 0x117   : > { %645 = vmatprep.mubr.f32.mxu0 %v408_v5  ;;  %1395 = vmatprep.mubr.f32.mxu1 %v406_v6 }
 0x11a   : > { %646 = vmatmul.mubr.f32.gmra.mrb[30].mxu0 %v407_v7  ;;  %1396 = vmatmul.mubr.f32.gmra.mrb[30].mxu1 %v409_v8 }
 0x11b   : > { %650 = vmatprep.mubr.f32.mxu0 %v411_v9  ;;  %1398 = vmatprep.mubr.f32.mxu1 %v412_v10  ;;  %v2457_v10 = vld [vmem:[%s258_s7] ss:$0 sm:$0xff] }
 0x11e   : > { %651 = vmatmul.mubr.f32.gmra.mrb[32].mxu0 %v410_v11  ;;  %1399 = vmatmul.mubr.f32.gmra.mrb[32].mxu1 %v415_v12 }
 0x11f   : > { %655 = vmatprep.mubr.f32.mxu0 %v414_v13  ;;  %1401 = vmatprep.mubr.f32.mxu1 %v418_v14 }
 0x122   : > { %656 = vmatmul.mubr.f32.gmra.mrb[34].mxu0 %v413_v15  ;;  %1402 = vmatmul.mubr.f32.gmra.mrb[34].mxu1 %v421_v16 }
 0x123   : > { %660 = vmatprep.mubr.f32.mxu0 %v417_v17  ;;  %1404 = vmatprep.mubr.f32.mxu1 %v424_v18 }
 0x126   : > { %661 = vmatmul.mubr.f32.gmra.mrb[36].mxu0 %v416_v19  ;;  %1405 = vmatmul.mubr.f32.gmra.mrb[36].mxu1 %v427_v20 }
 0x127   : > { %665 = vmatprep.mubr.f32.mxu0 %v420_v21  ;;  %1407 = vmatprep.mubr.f32.mxu1 %v430_v22 }
 0x12a   : > { %666 = vmatmul.mubr.f32.gmra.mrb[38].mxu0 %v419_v23  ;;  %1408 = vmatmul.mubr.f32.gmra.mrb[38].mxu1 %v433_v24 }
 0x12b   : > { %670 = vmatprep.mubr.f32.mxu0 %v423_v25  ;;  %1410 = vmatprep.mubr.f32.mxu1 %v436_v26 }
 0x12e   : > { %671 = vmatmul.mubr.f32.gmra.mrb[40].mxu0 %v422_v27  ;;  %1411 = vmatmul.mubr.f32.gmra.mrb[40].mxu1 %v439_v28 }
 0x12f   : > { %675 = vmatprep.mubr.f32.mxu0 %v426_v29  ;;  %1413 = vmatprep.mubr.f32.mxu1 %v442_v30 }
 0x132   : > { %676 = vmatmul.mubr.f32.gmra.mrb[42].mxu0 %v425_v31  ;;  %1414 = vmatmul.mubr.f32.gmra.mrb[42].mxu1 %v445_v32 }
 0x133   : > { %680 = vmatprep.mubr.f32.mxu0 %v429_v33  ;;  %1416 = vmatprep.mubr.f32.mxu1 %v448_v34 }
 0x136   : > { %681 = vmatmul.mubr.f32.gmra.mrb[44].mxu0 %v428_v35  ;;  %1417 = vmatmul.mubr.f32.gmra.mrb[44].mxu1 %v451_v36 }
 0x137   : > { %685 = vmatprep.mubr.f32.mxu0 %v432_v37  ;;  %1419 = vmatprep.mubr.f32.mxu1 %v454_v38 }
 0x13a   : > { %686 = vmatmul.mubr.f32.gmra.mrb[46].mxu0 %v431_v39  ;;  %1420 = vmatmul.mubr.f32.gmra.mrb[46].mxu1 %v457_v40 }
 0x1b1   : > { %v2436_v41 = vpop.f32.mrb[0].mxu1  ;;  %v572_v42 = vpop.f32.mrb[0].mxu0 }
 0x1b2   : > { %v694_v43 = vpop.f32.mrb[1].mxu1  ;;  %v574_v44 = vpop.f32.mrb[1].mxu0 }
 0x1b5   : > { %v2438_v45 = vpop.f32.mrb[2].mxu1  ;;  %v577_v46 = vpop.f32.mrb[2].mxu0 }
 0x1b6   : > { %v699_v47 = vpop.f32.mrb[3].mxu1  ;;  %v579_v48 = vpop.f32.mrb[3].mxu0 }
 0x1b9   : > { %v2440_v49 = vpop.f32.mrb[4].mxu1  ;;  %v582_v50 = vpop.f32.mrb[4].mxu0 }
 0x1ba   : > { %v704_v51 = vpop.f32.mrb[5].mxu1  ;;  %v584_v52 = vpop.f32.mrb[5].mxu0 }
 0x1bd   : > { %v2442_v53 = vpop.f32.mrb[6].mxu1  ;;  %v587_v54 = vpop.f32.mrb[6].mxu0 }
 0x1be   : > { %v709_v55 = vpop.f32.mrb[7].mxu1  ;;  %v589_v56 = vpop.f32.mrb[7].mxu0 }
 0x1c1   : > { %v2444_v57 = vpop.f32.mrb[8].mxu1  ;;  %v592_v58 = vpop.f32.mrb[8].mxu0 }
 0x1c2   : > { %v714_v59 = vpop.f32.mrb[9].mxu1  ;;  %v594_v60 = vpop.f32.mrb[9].mxu0 }
 0x1c5   : > { %v2446_v61 = vpop.f32.mrb[10].mxu1  ;;  %v597_v62 = vpop.f32.mrb[10].mxu0 }
 0x1c6   : > { %v719_v63 = vpop.f32.mrb[11].mxu1  ;;  %v599_v0 = vpop.f32.mrb[11].mxu0 }
 0x1c9   : > { %v2448_v1 = vpop.f32.mrb[12].mxu1  ;;  %v602_v2 = vpop.f32.mrb[12].mxu0 }
 0x1ca   : > { %v724_v3 = vpop.f32.mrb[13].mxu1  ;;  %v604_v4 = vpop.f32.mrb[13].mxu0 }
 0x1cd   : > { %v2450_v5 = vpop.f32.mrb[14].mxu1  ;;  %v607_v6 = vpop.f32.mrb[14].mxu0 }
 0x1ce   : > { %v729_v7 = vpop.f32.mrb[15].mxu1  ;;  %v609_v8 = vpop.f32.mrb[15].mxu0 }
 0x1d1   : > { %v1376_v9 = vpop.f32.mrb[16].mxu1  ;;  %v612_v11 = vpop.f32.mrb[16].mxu0 }
 0x1d2   : > { %v803_v12 = vadd.f32 %v1376_v9, %v577_v46  ;;  %v797_v13 = vpop.f32.mrb[17].mxu1  ;;  %v614_v14 = vpop.f32.mrb[17].mxu0 }
 0x1d3   : > { %v798_v15 = vadd.f32 %v797_v13, %v572_v42 }
 0x1d4   : > { %v1063_v16 = vadd.f32 %v2457_v10, %v803_v12 }
 0x1d5   : > { %v1062_v17 = vadd.f32 %v2457_v10, %v798_v15  ;;  %v1379_v18 = vpop.f32.mrb[18].mxu1  ;;  %v617_v19 = vpop.f32.mrb[18].mxu0 }
 0x1d6   : > { %1095 = vst [vmem:[%s2461_s11 + $0x8] sm:$0xff] %v1063_v16  ;;  %v813_v20 = vadd.f32 %v1379_v18, %v587_v54  ;;  %v807_v21 = vpop.f32.mrb[19].mxu1  ;;  %v619_v22 = vpop.f32.mrb[19].mxu0 }
 0x1d7   : > { %1094 = vst [vmem:[%s2461_s11] sm:$0xff] %v1062_v17  ;;  %v808_v23 = vadd.f32 %v807_v21, %v582_v50 }
 0x1d8   : > { %v1065_v24 = vadd.f32 %v2457_v10, %v813_v20 }
 0x1d9   : > { %v1064_v25 = vadd.f32 %v2457_v10, %v808_v23  ;;  %v1382_v26 = vpop.f32.mrb[20].mxu1  ;;  %v622_v27 = vpop.f32.mrb[20].mxu0 }
 0x1da   : > { %1097 = vst [vmem:[%s2461_s11 + $0x18] sm:$0xff] %v1065_v24  ;;  %v823_v28 = vadd.f32 %v1382_v26, %v597_v62  ;;  %v817_v29 = vpop.f32.mrb[21].mxu1  ;;  %v624_v30 = vpop.f32.mrb[21].mxu0 }
 0x1db   : > { %1096 = vst [vmem:[%s2461_s11 + $0x10] sm:$0xff] %v1064_v25  ;;  %v818_v31 = vadd.f32 %v817_v29, %v592_v58 }
 0x1dc   : > { %v1067_v32 = vadd.f32 %v2457_v10, %v823_v28 }
 0x1dd   : > { %v1066_v33 = vadd.f32 %v2457_v10, %v818_v31  ;;  %v1385_v34 = vpop.f32.mrb[22].mxu1  ;;  %v627_v35 = vpop.f32.mrb[22].mxu0 }
 0x1de   : > { %1099 = vst [vmem:[%s2461_s11 + $0x28] sm:$0xff] %v1067_v32  ;;  %v833_v36 = vadd.f32 %v1385_v34, %v607_v6  ;;  %v827_v37 = vpop.f32.mrb[23].mxu1  ;;  %v629_v38 = vpop.f32.mrb[23].mxu0 }
 0x1df   : > { %1098 = vst [vmem:[%s2461_s11 + $0x20] sm:$0xff] %v1066_v33  ;;  %v828_v39 = vadd.f32 %v827_v37, %v602_v2 }
 0x1e0   : > { %v1069_v40 = vadd.f32 %v2457_v10, %v833_v36 }
 0x1e1   : > { %v1068_v42 = vadd.f32 %v2457_v10, %v828_v39  ;;  %v1388_v43 = vpop.f32.mrb[24].mxu1  ;;  %v632_v44 = vpop.f32.mrb[24].mxu0 }
 0x1e2   : > { %1101 = vst [vmem:[%s2461_s11 + $0x38] sm:$0xff] %v1069_v40  ;;  %v843_v46 = vadd.f32 %v1388_v43, %v617_v19  ;;  %v837_v47 = vpop.f32.mrb[25].mxu1  ;;  %v634_v48 = vpop.f32.mrb[25].mxu0 }
 0x1e3   : > { %1100 = vst [vmem:[%s2461_s11 + $0x30] sm:$0xff] %v1068_v42  ;;  %v838_v50 = vadd.f32 %v837_v47, %v612_v11 }
 0x1e4   : > { %v1071_v51 = vadd.f32 %v2457_v10, %v843_v46 }
 0x1e5   : > { %v1070_v52 = vadd.f32 %v2457_v10, %v838_v50  ;;  %v1391_v54 = vpop.f32.mrb[26].mxu1  ;;  %v637_v55 = vpop.f32.mrb[26].mxu0 }
 0x1e6   : > { %1103 = vst [vmem:[%s2461_s11 + $0x48] sm:$0xff] %v1071_v51  ;;  %v853_v56 = vadd.f32 %v1391_v54, %v627_v35  ;;  %v847_v58 = vpop.f32.mrb[27].mxu1  ;;  %v639_v59 = vpop.f32.mrb[27].mxu0 }
 0x1e7   : > { %1102 = vst [vmem:[%s2461_s11 + $0x40] sm:$0xff] %v1070_v52  ;;  %v848_v60 = vadd.f32 %v847_v58, %v622_v27 }
 0x1e8   : > { %v1073_v62 = vadd.f32 %v2457_v10, %v853_v56 }
 0x1e9   : > { %v1072_v63 = vadd.f32 %v2457_v10, %v848_v60  ;;  %v1394_v0 = vpop.f32.mrb[28].mxu1  ;;  %v642_v2 = vpop.f32.mrb[28].mxu0 }
 0x1ea   : > { %1105 = vst [vmem:[%s2461_s11 + $0x58] sm:$0xff] %v1073_v62  ;;  %v863_v3 = vadd.f32 %v1394_v0, %v637_v55  ;;  %v857_v4 = vpop.f32.mrb[29].mxu1  ;;  %v644_v6 = vpop.f32.mrb[29].mxu0 }
 0x1eb   : > { %1104 = vst [vmem:[%s2461_s11 + $0x50] sm:$0xff] %v1072_v63  ;;  %v858_v7 = vadd.f32 %v857_v4, %v632_v44 }
 0x1ec   : > { %v1075_v8 = vadd.f32 %v2457_v10, %v863_v3 }
 0x1ed   : > { %v1074_v9 = vadd.f32 %v2457_v10, %v858_v7  ;;  %v1397_v11 = vpop.f32.mrb[30].mxu1  ;;  %v647_v12 = vpop.f32.mrb[30].mxu0 }
 0x1ee   : > { %1107 = vst [vmem:[%s2461_s11 + $0x68] sm:$0xff] %v1075_v8  ;;  %v873_v13 = vadd.f32 %v1397_v11, %v647_v12  ;;  %v867_v14 = vpop.f32.mrb[31].mxu1  ;;  %v649_v15 = vpop.f32.mrb[31].mxu0 }
 0x1ef   : > { %1106 = vst [vmem:[%s2461_s11 + $0x60] sm:$0xff] %v1074_v9  ;;  %v868_v16 = vadd.f32 %v867_v14, %v642_v2 }
 0x1f0   : > { %v1077_v17 = vadd.f32 %v2457_v10, %v873_v13 }
 0x1f1   : > { %v1076_v18 = vadd.f32 %v2457_v10, %v868_v16  ;;  %v1400_v19 = vpop.f32.mrb[32].mxu1  ;;  %v652_v20 = vpop.f32.mrb[32].mxu0 }
 0x1f2   : > { %1109 = vst [vmem:[%s2461_s11 + $0x78] sm:$0xff] %v1077_v17  ;;  %v877_v21 = vpop.f32.mrb[33].mxu1  ;;  %v654_v22 = vpop.f32.mrb[33].mxu0 }
 0x1f3   : > { %1108 = vst [vmem:[%s2461_s11 + $0x70] sm:$0xff] %v1076_v18  ;;  %v878_v23 = vadd.f32 %v877_v21, %v652_v20 }
 0x1f5   : > { %v1078_v24 = vadd.f32 %v2457_v10, %v878_v23  ;;  %v657_v25 = vpop.f32.mrb[34].mxu0  ;;  %v1403_v26 = vpop.f32.mrb[34].mxu1 }
 0x1f6   : > { %v883_v27 = vadd.f32 %v1400_v19, %v657_v25  ;;  %v887_v28 = vpop.f32.mrb[35].mxu1  ;;  %v659_v29 = vpop.f32.mrb[35].mxu0 }
 0x1f7   : > { %1110 = vst [vmem:[%s2461_s11 + $0x80] sm:$0xff] %v1078_v24 }
 0x1f8   : > { %v1079_v30 = vadd.f32 %v2457_v10, %v883_v27 }
 0x1f9   : > { %v662_v31 = vpop.f32.mrb[36].mxu0  ;;  %v1406_v32 = vpop.f32.mrb[36].mxu1 }
 0x1fa   : > { %1111 = vst [vmem:[%s2461_s11 + $0x88] sm:$0xff] %v1079_v30  ;;  %v888_v33 = vadd.f32 %v887_v28, %v662_v31  ;;  %v897_v34 = vpop.f32.mrb[37].mxu1  ;;  %v664_v35 = vpop.f32.mrb[37].mxu0 }
 0x1fc   : > { %v1080_v36 = vadd.f32 %v2457_v10, %v888_v33 }
 0x1fd   : > { %v667_v37 = vpop.f32.mrb[38].mxu0  ;;  %v1409_v38 = vpop.f32.mrb[38].mxu1 }
 0x1fe   : > { %1112 = vst [vmem:[%s2461_s11 + $0x90] sm:$0xff] %v1080_v36  ;;  %v893_v39 = vadd.f32 %v1403_v26, %v667_v37  ;;  %v907_v40 = vpop.f32.mrb[39].mxu1  ;;  %v669_v42 = vpop.f32.mrb[39].mxu0 }
 0x200   : > { %v1081_v43 = vadd.f32 %v2457_v10, %v893_v39 }
 0x201   : > { %v672_v44 = vpop.f32.mrb[40].mxu0  ;;  %v1412_v46 = vpop.f32.mrb[40].mxu1 }
 0x202   : > { %1113 = vst [vmem:[%s2461_s11 + $0x98] sm:$0xff] %v1081_v43  ;;  %v898_v47 = vadd.f32 %v897_v34, %v672_v44  ;;  %v923_v48 = vadd.f32 %v1412_v46, %v2438_v45  ;;  %v917_v50 = vpop.f32.mrb[41].mxu1  ;;  %v674_v51 = vpop.f32.mrb[41].mxu0 }
 0x203   : > { %v918_v52 = vadd.f32 %v917_v50, %v2436_v41 }
 0x204   : > { %v1082_v54 = vadd.f32 %v2457_v10, %v898_v47  ;;  %v1087_v55 = vadd.f32 %v2457_v10, %v923_v48 }
 0x205   : > { %v1086_v56 = vadd.f32 %v2457_v10, %v918_v52  ;;  %v677_v58 = vpop.f32.mrb[42].mxu0  ;;  %v1415_v59 = vpop.f32.mrb[42].mxu1 }
 0x206   : > { %1114 = vst [vmem:[%s2461_s11 + $0xa0] sm:$0xff] %v1082_v54  ;;  %1119 = vst [vmem:[%s2461_s11 + $0xc8] sm:$0xff] %v1087_v55  ;;  %v903_v45 = vadd.f32 %v1406_v32, %v677_v58  ;;  %v933_v60 = vadd.f32 %v1415_v59, %v2442_v53  ;;  %v927_v62 = vpop.f32.mrb[43].mxu1  ;;  %v679_v41 = vpop.f32.mrb[43].mxu0 }
 0x207   : > { %1118 = vst [vmem:[%s2461_s11 + $0xc0] sm:$0xff] %v1086_v56  ;;  %v928_v63 = vadd.f32 %v927_v62, %v2440_v49 }
 0x208   : > { %v1083_v0 = vadd.f32 %v2457_v10, %v903_v45  ;;  %v1089_v2 = vadd.f32 %v2457_v10, %v933_v60 }
 0x209   : > { %v1088_v3 = vadd.f32 %v2457_v10, %v928_v63  ;;  %v682_v4 = vpop.f32.mrb[44].mxu0  ;;  %v1418_v6 = vpop.f32.mrb[44].mxu1 }
 0x20a   : > { %1115 = vst [vmem:[%s2461_s11 + $0xa8] sm:$0xff] %v1083_v0  ;;  %1121 = vst [vmem:[%s2461_s11 + $0xd8] sm:$0xff] %v1089_v2  ;;  %v908_v53 = vadd.f32 %v907_v40, %v682_v4  ;;  %v943_v7 = vadd.f32 %v1418_v6, %v2446_v61  ;;  %v937_v8 = vpop.f32.mrb[45].mxu1  ;;  %v684_v9 = vpop.f32.mrb[45].mxu0 }
 0x20b   : > { %1120 = vst [vmem:[%s2461_s11 + $0xd0] sm:$0xff] %v1088_v3  ;;  %v938_v49 = vadd.f32 %v937_v8, %v2444_v57 }
 0x20c   : > { %v1084_v11 = vadd.f32 %v2457_v10, %v908_v53  ;;  %v1091_v12 = vadd.f32 %v2457_v10, %v943_v7 }
 0x20d   : > { %v1090_v13 = vadd.f32 %v2457_v10, %v938_v49  ;;  %v687_v14 = vpop.f32.mrb[46].mxu0  ;;  %v1421_v15 = vpop.f32.mrb[46].mxu1 }
 0x20e   : > { %1116 = vst [vmem:[%s2461_s11 + $0xb0] sm:$0xff] %v1084_v11  ;;  %1123 = vst [vmem:[%s2461_s11 + $0xe8] sm:$0xff] %v1091_v12  ;;  %v913_v61 = vadd.f32 %v1409_v38, %v687_v14  ;;  %v953_v16 = vadd.f32 %v1421_v15, %v2450_v5  ;;  %v947_v57 = vpop.f32.mrb[47].mxu1  ;;  %v689_v17 = vpop.f32.mrb[47].mxu0 }
 0x20f   : > { %1122 = vst [vmem:[%s2461_s11 + $0xe0] sm:$0xff] %v1090_v13  ;;  %v948_v18 = vadd.f32 %v947_v57, %v2448_v1 }
 0x210   : > { %v1085_v19 = vadd.f32 %v2457_v10, %v913_v61  ;;  %v1093_v20 = vadd.f32 %v2457_v10, %v953_v16 }
 0x211   : > { %v1092_v5 = vadd.f32 %v2457_v10, %v948_v18 }
 0x212   : > { %1117 = vst [vmem:[%s2461_s11 + $0xb8] sm:$0xff] %v1085_v19  ;;  %1125 = vst [vmem:[%s2461_s11 + $0xf8] sm:$0xff] %v1093_v20 }
 0x213   : > { %1124 = vst [vmem:[%s2461_s11 + $0xf0] sm:$0xff] %v1092_v5 }
 0x214   : > { %1788 = shalt.err (!%p1785_p1)
}
 0x215   : > { %s1789_s29 = scalar_lea.hbm %s2533_s9, 4096  ;;  %s1793_s11 = scalar_lea.hbm %s2678_s3, 147456 }
 0x216   : > { %p1790_p0 = scmp.ne.s32.totalorder %s2533_s9, %s1789_s29  ;;  %p1794_p8 = scmp.lt.u32.totalorder %s2533_s9, %s2678_s3 }
 0x217   : > { %p1795_p5 = scmp.lt.u32.totalorder %s1793_s11, %s1789_s29  ;;  %p1797_p13 = scmp.lt.u32.totalorder %s1789_s29, %s2533_s9 }
 0x218   : > { %p1791_p3 = pnand %p1790_p0, %p2679_p12 }
 0x219   : > { %p1796_p6 = por %p1795_p5, %p1794_p8 }
 0x21a   : > { %p1792_p7 = pneg %p1791_p3 }
 0x21b   : > { %p1798_p11 = por %p1797_p13, %p1796_p6 }
 0x21d   : > { %p1799_p10 = pnand %p1798_p11, %p1792_p7 }
 0x21f   : > { %1802 = shalt.err (!%p1799_p10)
}
 0x220   : > { %s1937_s1 = smov 128   ;;  %s1938_s21 = smov 1152  }
 0x221   : > { %s1939_s18 = smov 8  }
 0x222   : > { %1546 = dma.vmem_to_hbm [thread:$0]  (%p2679_p12), %s2537_s0, 4096, %s2533_s9, %s2545_s30, %s1937_s1, %s1938_s21, %s1939_s18  }
 0x223 PF: > { %p1563_p2 = scmp.ge.s32.totalorder %s1925_s25, 2  ;;  %s1157_s22 = sand.u32 1, %s1873_s12  }
 0x224   : > { %p2680_p9 = scmp.ne.s32.totalorder %s2665_s28, 0  ;;  %s1158_s10 = scalar_lea.sflag [#allocation5], %s1157_s22 }
 0x226   : > { %p1559_p4 = pnand %p1563_p2, %p2680_p9 }
 0x228   : > { %1868 = dma.done.wait (!%p1559_p4), %s1158_s10, 4096  }
 0x229   : > { %1870 = vsyncadd (!%p1559_p4), %s1158_s10, 4294963200  ;;  %s22_s25 = sadd.s32 1, %s1925_s25   ;;  %s2682_s0 = sld [smem:[#allocation20_spill]] }
 0x22a   : > { %p2574_p1 = scmp.ge.s32.totalorder %s22_s25, 38   ;;  %s2683_s9 = sld [smem:[#allocation13_spill]] }
 0x22b   : > { %s2684_s20 = sld [smem:[#allocation21_spill]]  ;;  %s2685_s22 = sld [smem:[#allocation16_spill]] }
 0x22c   : > { %s2686_s28 = sld [smem:[#allocation17_spill]]  ;;  %s2687_s24 = sld [smem:[#allocation18_spill]] }
 0x22d   : > { %s2688_s12 = smov %s1877_s13  ;;  %s2689_s13 = smov %s1881_s14 }
 0x22e   : > { %s2690_s14 = smov %s2156_s26  ;;  %s2691_s15 = smov %s1889_s16 }
 0x22f   : > { %s2692_s16 = smov %s1893_s17  ;;  %s2693_s17 = smov %s2682_s0 }
 0x230   : > { %s2694_s18 = smov %s1901_s19  ;;  %s2695_s19 = smov %s2683_s9 }
 0x231   : > { %s2696_s21 = smov %s1917_s23  ;;  %21 = sbr.rel (!%p2574_p1) target bundleno = 16 (0x10), region = 109 }
 0x232   : > { %s2697_s23 = smov %s2686_s28 }
 0x238   :  { %1163 = vsyncpa [#allocation4], 1 }
 0x239   :  { %1165 = vsyncpa [#allocation4 + $0x1], 1 }
 0x23a   :  { %1166 = vsyncpa [#allocation7], 1 }
 0x23b   :  { %1168 = vsyncpa [#allocation7 + $0x1], 1 }
 0x23c   :  { %1169 = vsyncpa [#allocation5], 1 }
 0x23d   :  { %1171 = vsyncpa [#allocation5 + $0x1], 1 }

</bundles_post_ra>
